<compile_context>
chip_gen: v7x
topology: tpu7x:2x2x1
jax: 0.10.0
libtpu: 0.0.40
codegen_flags: <defaults>
</compile_context>

<pallas_src>
import jax
import jax.numpy as jnp
from jax.experimental import pallas as pl
from jax.experimental.pallas import tpu as pltpu


def _patch_unembed_kernel(x_ref, o_ref):
    # x_ref: (l_blk, c_blk) tile of the (B, L, C) input   (batch dim squeezed)
    # o_ref: (c_blk, l_blk) tile of the flattened (B, C, L) output
    o_ref[...] = x_ref[...].T  # single XLU transpose per coarse block


def _largest_divisor_multiple(dim, multiple, max_val):
    """Largest divisor of `dim` that is a multiple of `multiple` and <= max_val (None if none)."""
    hi = min(dim, max_val)
    best = None
    d = multiple
    while d <= hi:
        if dim % d == 0:
            best = d
        d += multiple
    return best


def _vmem_budget_bytes():
    """(max_block_bytes, vmem_limit_bytes) derived from the chip's physical VMEM."""
    cap = None
    try:
        info = pltpu.get_tpu_info()
        cap = getattr(info, "vmem_capacity_bytes", None)
    except Exception:
        cap = None
    if cap is None:
        cap = 64 * 1024 * 1024  # conservative (v7x-level) if the query is unavailable
    if cap >= 100 * 1024 * 1024:
        # v5e / v6e: 128 MiB physical VMEM -> big blocks, raise the scoped limit.
        return 8 * 1024 * 1024, 64 * 1024 * 1024
    # v7x: 64 MiB physical VMEM -> smaller blocks, leave headroom for Mosaic scratch.
    return 4 * 1024 * 1024, 44 * 1024 * 1024


def _choose_blocks(b, l, c, itemsize, max_block_bytes):
    """Pick (l_blk, c_blk) or return None to fall back to the XLA transpose path."""
    if c < 128:
        # Lane-sparse input tiles (C of 128 lanes used) — not worth a custom kernel.
        return None

    # Channel block: full C is always BlockSpec-legal; otherwise a mult-of-128 divisor.
    if c % 128 == 0:
        c_blk = _largest_divisor_multiple(c, 128, min(c, 1024)) or c
    else:
        c_blk = c

    # Clamp: even the minimal lane-dense L block (128) must fit the byte budget.
    if c_blk * 128 * itemsize > max_block_bytes:
        if c % 128 == 0:
            c_blk = 128
            if c_blk * 128 * itemsize > max_block_bytes:
                return None
        else:
            return None  # awkward large C — don't risk scoped-VMEM overflow

    budget_elems = max_block_bytes // (c_blk * itemsize)
    l_blk = _largest_divisor_multiple(l, 128, budget_elems)
    if l_blk is None:
        # Full L is legal only if it actually fits the budget.
        if l * c_blk * itemsize <= max_block_bytes:
            l_blk = l
        else:
            return None

    # Megacore guard (v7x has 2 TensorCores): avoid a 1-point grid when B == 1.
    if b == 1 and (l // l_blk) == 1 and (c // c_blk) == 1:
        smaller_l = _largest_divisor_multiple(l, 128, l // 2)
        if smaller_l is not None:
            l_blk = smaller_l
        elif c % 256 == 0:
            c_blk = c // 2

    return l_blk, c_blk


def patch_unembed(x, x_size):
    """(B, H*W, C) -> (B, C, H, W); matches PatchUnEmbed.forward."""
    b, l, c = x.shape
    h, w = x_size
    assert l == h * w, f"sequence length {l} != H*W = {h}*{w}"
    itemsize = jnp.dtype(x.dtype).itemsize

    max_block_bytes, vmem_limit_bytes = _vmem_budget_bytes()
    blocks = _choose_blocks(b, l, c, itemsize, max_block_bytes)

    if blocks is None:
        # Small / awkward shapes: let XLA do the transpose (still exact semantics).
        return jnp.transpose(x, (0, 2, 1)).reshape(b, c, h, w)

    l_blk, c_blk = blocks
    grid = (b, l // l_blk, c // c_blk)

    out_flat = pl.pallas_call(
        _patch_unembed_kernel,
        out_shape=jax.ShapeDtypeStruct((b, c, l), x.dtype),
        grid_spec=pltpu.PrefetchScalarGridSpec(
            num_scalar_prefetch=0,
            grid=grid,
            in_specs=[
                pl.BlockSpec((None, l_blk, c_blk), lambda bi, li, ci: (bi, li, ci)),
            ],
            out_specs=pl.BlockSpec(
                (None, c_blk, l_blk), lambda bi, li, ci: (bi, ci, li)
            ),
        ),
        compiler_params=pltpu.CompilerParams(
            dimension_semantics=("parallel", "parallel", "parallel"),
            vmem_limit_bytes=vmem_limit_bytes,
        ),
        cost_estimate=pl.CostEstimate(
            flops=0,
            transcendentals=0,
            bytes_accessed=2 * b * l * c * itemsize,
        ),
    )(x)

    # Contiguous split of the last dim (L -> H, W): no data movement.
    return out_flat.reshape(b, c, h, w)


def _reference(x, x_size):
    b, l, c = x.shape
    h, w = x_size
    return jnp.transpose(x, (0, 2, 1)).reshape(b, c, h, w)


if __name__ == "__main__":
    key = jax.random.PRNGKey(0)

    # 1) Pallas path: C >= 128 so the custom kernel is exercised.
    batch, height, width, embed_dim = 2, 16, 16, 128
    k1, k2 = jax.random.split(key)
    x_big = jax.random.normal(k1, (batch, height * width, embed_dim), dtype=jnp.float32)
    out_big = jax.block_until_ready(patch_unembed(x_big, (height, width)))
    ref_big = _reference(x_big, (height, width))
    assert out_big.shape == ref_big.shape, (out_big.shape, ref_big.shape)
    assert jnp.allclose(out_big, ref_big), "mismatch vs. reference (Pallas path)"

    # 2) Small-C guard path (typical embed_dim=32): lane-sparse -> XLA fallback.
    embed_small = 32
    x_small = jax.random.normal(k2, (batch, height * width, embed_small), dtype=jnp.float32)
    out_small = jax.block_until_ready(patch_unembed(x_small, (height, width)))
    ref_small = _reference(x_small, (height, width))
    assert out_small.shape == ref_small.shape, (out_small.shape, ref_small.shape)
    assert jnp.allclose(out_small, ref_small), "mismatch vs. reference (fallback path)"

    print("KERNEL_OK")
</pallas_src>

<mosaic_0001>
module attributes {stable_mosaic.version = 11 : i64} {
  func.func @_patch_unembed_kernel(%arg0: i32, %arg1: i32, %arg2: i32, %arg3: memref<1x256x128xf32, #tpu.memory_space<vmem>>, %arg4: memref<1x128x256xf32, #tpu.memory_space<vmem>>) attributes {dimension_semantics = [#tpu.dimension_semantics<parallel>, #tpu.dimension_semantics<parallel>, #tpu.dimension_semantics<parallel>], iteration_bounds = array<i64: 2, 1, 1>, scalar_prefetch = 0 : i64, scratch_operands = 0 : i64, tpu.core_type = #tpu.core_type<tc>, window_params = [{transform_indices = @transform_0, window_bounds = array<i64: 1, 256, 128>}, {transform_indices = @transform_1, window_bounds = array<i64: 1, 128, 256>}]} {
    %c0 = arith.constant 0 : index
    %c0_0 = arith.constant 0 : index
    %c0_1 = arith.constant 0 : index
    %0 = vector.load %arg3[%c0, %c0_0, %c0_1] : memref<1x256x128xf32, #tpu.memory_space<vmem>>, vector<1x256x128xf32>
    %1 = vector.shape_cast %0 : vector<1x256x128xf32> to vector<256x128xf32>
    %2 = tpu.transpose %1, [1, 0] : vector<256x128xf32> -> vector<128x256xf32>
    %c0_2 = arith.constant 0 : index
    %c0_3 = arith.constant 0 : index
    %c0_4 = arith.constant 0 : index
    %3 = vector.load %arg4[%c0_2, %c0_3, %c0_4] : memref<1x128x256xf32, #tpu.memory_space<vmem>>, vector<1x128x256xf32>
    %4 = vector.shape_cast %3 : vector<1x128x256xf32> to vector<128x256xf32>
    %5 = vector.shape_cast %2 : vector<128x256xf32> to vector<1x128x256xf32>
    tpu.vector_store %arg4[%c0_2, %c0_3, %c0_4], %5 {strides = array<i32>} : memref<1x128x256xf32, #tpu.memory_space<vmem>>, vector<1x128x256xf32>,
    return
  }
  func.func @transform_0(%arg0: i32, %arg1: i32, %arg2: i32) -> (i32, i32, i32) {
    %c0_i32 = arith.constant 0 : i32
    return %arg0, %arg1, %arg2 : i32, i32, i32
  }
  func.func @transform_1(%arg0: i32, %arg1: i32, %arg2: i32) -> (i32, i32, i32) {
    %c0_i32 = arith.constant 0 : i32
    return %arg0, %arg2, %arg1 : i32, i32, i32
  }
}

</mosaic_0001>

<bundles_post_ra>
// kernel: tpu_custom_call.1
= control target key start
LH: loop header
LB: loop body
LE: loop exit
PB: predicated region body
PF: predicated region fallthrough
CT: control target
= control target key end

     0   :  { %6 = vsyncpa [#allocation3], 0  ;;  %s869_s0 = inlined_call_operand.hbm [shape: f32[2,256,128], index: 0, kind: input, shape index: {}]   ;;  %s870_s1 = inlined_call_operand.hbm [shape: f32[2,128,256], index: 1, kind: output, shape index: {}]  }
   0x1   :  { %8 = vsyncpa [#allocation3 + $0x1], 0 }
   0x2   :  { %9 = vsyncpa [#allocation4], 0 }
   0x3   :  { %11 = vsyncpa [#allocation4 + $0x1], 0  ;;  %s621_s6 = smov 0   ;;  %s623_s7 = smov 0  }
   0x4   :  { %s625_s8 = smov 0   ;;  %s627_s9 = smov 0  }
   0x5   :  { %s629_s10 = smov 0   ;;  %s631_s11 = smov 0  }
   0x6 LB: > { %s408_s12 = sadd.s32 4294967295, %s603_s11   ;;  %s409_s13 = sadd.s32 4294967294, %s603_s11   ;;  %s603_s11 = sphi %s631_s11, %s17_s11   ;;  %s599_s10 = sphi %s629_s10, %s885_s10   ;;  %s595_s9 = sphi %s627_s9, %s884_s9   ;;  %s591_s8 = sphi %s625_s8, %s883_s8   ;;  %s587_s7 = sphi %s623_s7, %s882_s7   ;;  %s583_s6 = sphi %s621_s6, %s881_s6  }
   0x7   : > { %s36_s14 = sadd.s32 1, %s599_s10  ;;  %s47_s15 = sadd.s32 1, %s591_s8 }
   0x8   : > { %p38_p0 = scmp.ge.s32.totalorder %s36_s14, 2  ;;  %p54_p1 = scmp.ne.s32.totalorder %s591_s8, %s587_s7 }
   0x9   : > { %p55_p2 = scmp.eq.s32.totalorder %s603_s11, 0  ;;  %p60_p3 = scmp.ne.s32.totalorder %s587_s7, %s583_s6 }
   0xa   : > { %s887_s14 = smov (%p38_p0, %s36_s14), 0  ;;  %p61_p5 = scmp.eq.s32.totalorder %s408_s12, 0 }
   0xb   : > { %p662_p4 = por %p55_p2, %p54_p1  ;;  %s40_s17 = ssub.s32 %s599_s10, %s887_s14 }
   0xc   : > { %p88_p6 = scmp.eq.s32.totalorder %s408_s12, 1  ;;  %p45_p7 = scmp.eq.s32.totalorder %s40_s17, 0 }
   0xd   : > { %p668_p8 = por %p61_p5, %p60_p3  ;;  %p94_p10 = scmp.eq.s32.totalorder %s409_s13, 1 }
   0xe   : > { %p672_p9 = por %p88_p6, %p54_p1  ;;  %p437_p13 = scmp.lt.s32.totalorder %s603_s11, 2 }
   0xf   : > { %s677_s20 = scalar_select %p45_p7, %s591_s8, %s47_s15  }
  0x10   : > { %s874_s19 = scalar_select %p672_p9, 1, 0 }
  0x11   : > { %p679_p11 = por %p94_p10, %p60_p3  ;;  %s114_s22 = sand.u32 1, %s591_s8  }
  0x12   : > { %s412_s23 = sshll.u32 %s114_s22, 8  ;;  %s423_s24 = sshll.u32 %s599_s10, 12 }
  0x13   : > { %s875_s21 = scalar_select %p679_p11, 1, 0 }
  0x14   : > { %s690_s27 = scalar_lea.hbm %s869_s0, %s423_s24  ;;  %s118_s28 = scalar_lea.vmem [#allocation2], %s412_s23 }
  0x15   : > { %s128_s29 = sshll.u32 %s118_s28, 4  ;;  %p696_p0 = pnand %p437_p13, %p662_p4  ;;  %s692_s29 = int_to_ptr.vmem [resolvable:$true] %s128_s29 }
  0x16   : > { %s701_s2 = scalar_lea.sflag [#allocation3], %s114_s22  ;;  %s491_s3 = scalar_lea.hbm %s690_s27, 4096 }
  0x17   : > { %p492_p2 = scmp.ne.s32.totalorder %s690_s27, %s491_s3  ;;  %p493_p3 = pneg %p696_p0 }
  0x18   : > { %s496_s12 = scalar_lea.hbm %s869_s0, 8192  ;;  %p497_p4 = scmp.lt.u32.totalorder %s690_s27, %s869_s0 }
  0x19   : > { %p494_p5 = pnand %p493_p3, %p492_p2  ;;  %p498_p7 = scmp.lt.u32.totalorder %s496_s12, %s491_s3 }
  0x1a   : > { %p500_p13 = scmp.lt.u32.totalorder %s491_s3, %s690_s27 }
  0x1b   : > { %p495_p6 = pneg %p494_p5  ;;  %p499_p10 = por %p498_p7, %p497_p4 }
  0x1d   : > { %p501_p12 = por %p500_p13, %p499_p10 }
  0x1f   : > { %p502_p1 = pnand %p501_p12, %p495_p6 }
  0x21   : > { %505 = shalt.err (!%p502_p1)
}
  0x22   : > { %s506_s16 = scalar_lea.vmem %s692_s29, 4096  ;;  %s605_s17 = smov [#allocation2]  }
  0x23   : > { %p507_p2 = scmp.ne.s32.totalorder %s692_s29, %s506_s16  ;;  %s511_s22 = sshll.u32 %s605_s17, 4  ;;  %s512_s22 = int_to_ptr.vmem [resolvable:$false] %s511_s22 }
  0x24   : > { %s513_s23 = scalar_lea.vmem %s512_s22, 8192  ;;  %p514_p9 = scmp.lt.s32.totalorder %s692_s29, %s512_s22 }
  0x25   : > { %p509_p5 = pnand %p507_p2, %p493_p3  ;;  %p515_p4 = scmp.lt.s32.totalorder %s513_s23, %s506_s16 }
  0x27   : > { %p510_p11 = pneg %p509_p5  ;;  %p516_p7 = por %p515_p4, %p514_p9 }
  0x29   : > { %p517_p10 = pnand %p516_p7, %p510_p11 }
  0x2b   : > { %520 = shalt.err (!%p517_p10)
}
  0x2c   : > { %s606_s24 = smov 128   ;;  %s607_s25 = smov 8  }
  0x2d   : > { %432 = dma.hbm_to_vmem [thread:$0]  (!%p696_p0), %s690_s27, 4096, %s692_s29, %s701_s2, %s606_s24, %s606_s24, %s607_s25  }
  0x2e   : > { %p136_p12 = scmp.lt.s32.totalorder %s603_s11, 3  ;;  %p877_p1 = scmp.ge.s32.totalorder %s603_s11, 1 }
  0x30   : > { %p137_p3 = pnand %p877_p1, %p136_p12 }
  0x31   : > { %s733_s26 = sand.u32 (!%p137_p3), 1, %s587_s7  }
  0x32   : > { %140 = sbr.rel (%p137_p3) target bundleno = 264 (0x108), region = 24  ;;  %s416_s28 = sshll.u32 (!%p137_p3), %s733_s26, 8 }
  0x33   : > { %s143_s3 = scalar_lea.sflag (!%p137_p3), [#allocation3], %s733_s26  ;;  %s739_s4 = scalar_lea.vmem (!%p137_p3), [#allocation2], %s416_s28 }
  0x39   : > { %574 = dma.done.wait (%p668_p8), %s143_s3, 4096  }
  0x3a   : > { %576 = vsyncadd (%p668_p8), %s143_s3, 4294963200  ;;  %v184_v0 = vld [vmem:[%s739_s4 + $0x80] sm:$0xff]  ;;  %v185_v2 = vld [vmem:[%s739_s4 + $0x88] sm:$0xff]  ;;  %s779_s18 = scalar_lea.vmem [#allocation5], %s416_s28  ;;  %s424_s27 = sshll.u32 %s595_s9, 12 }
  0x3b   : > { %v168_v1 = vld [vmem:[%s739_s4] sm:$0xff]  ;;  %232 = vxpose.xlu1.b32.start [1/16] %v184_v0, 128  ;;  %v169_v3 = vld [vmem:[%s739_s4 + $0x8] sm:$0xff]  ;;  %v186_v4 = vld [vmem:[%s739_s4 + $0x90] sm:$0xff]  ;;  %s315_s29 = sshll.u32 %s779_s18, 4  ;;  %s816_s5 = scalar_lea.hbm %s870_s1, %s424_s27  ;;  %s818_s29 = int_to_ptr.vmem [resolvable:$true] %s315_s29 }
  0x3c   : > { %200 = vxpose.xlu0.b32.start [1/16] %v168_v1, 128  ;;  %v170_v5 = vld [vmem:[%s739_s4 + $0x10] sm:$0xff]  ;;  %v187_v6 = vld [vmem:[%s739_s4 + $0x98] sm:$0xff]  ;;  %v188_v8 = vld [vmem:[%s739_s4 + $0xa0] sm:$0xff]  ;;  %s297_s9 = scalar_lea.sflag [#allocation4], %s733_s26  ;;  %s521_s12 = scalar_lea.vmem %s818_s29, 4096 }
  0x3d   : > { %v171_v7 = vld [vmem:[%s739_s4 + $0x18] sm:$0xff]  ;;  %v172_v9 = vld [vmem:[%s739_s4 + $0x20] sm:$0xff]  ;;  %v189_v10 = vld [vmem:[%s739_s4 + $0xa8] sm:$0xff]  ;;  %p522_p8 = scmp.ne.s32.totalorder %s818_s29, %s521_s12  ;;  %p878_p9 = scmp.ne.s32.totalorder %s874_s19, 0 }
  0x3e   : > { %v173_v11 = vld [vmem:[%s739_s4 + $0x28] sm:$0xff]  ;;  %v190_v12 = vld [vmem:[%s739_s4 + $0xb0] sm:$0xff]  ;;  %v191_v14 = vld [vmem:[%s739_s4 + $0xb8] sm:$0xff]  ;;  %s608_s13 = smov [#allocation5]  }
  0x3f   : > { %233 = vxpose.xlu1.b32.cont [2/16] %v185_v2, 128  ;;  %v174_v13 = vld [vmem:[%s739_s4 + $0x30] sm:$0xff]  ;;  %v175_v15 = vld [vmem:[%s739_s4 + $0x38] sm:$0xff]  ;;  %v192_v16 = vld [vmem:[%s739_s4 + $0xc0] sm:$0xff]  ;;  %p523_p11 = pnand %p522_p8, %p878_p9  ;;  %s525_s15 = sshll.u32 %s608_s13, 4  ;;  %s526_s15 = int_to_ptr.vmem [resolvable:$false] %s525_s15 }
  0x40   : > { %201 = vxpose.xlu0.b32.cont [2/16] %v169_v3, 128  ;;  %v176_v17 = vld [vmem:[%s739_s4 + $0x40] sm:$0xff]  ;;  %v193_v18 = vld [vmem:[%s739_s4 + $0xc8] sm:$0xff]  ;;  %v194_v20 = vld [vmem:[%s739_s4 + $0xd0] sm:$0xff]  ;;  %s527_s16 = scalar_lea.vmem %s526_s15, 8192  ;;  %p528_p6 = scmp.lt.s32.totalorder %s818_s29, %s526_s15 }
  0x41   : > { %v177_v19 = vld [vmem:[%s739_s4 + $0x48] sm:$0xff]  ;;  %v178_v21 = vld [vmem:[%s739_s4 + $0x50] sm:$0xff]  ;;  %v195_v22 = vld [vmem:[%s739_s4 + $0xd8] sm:$0xff]  ;;  %p524_p0 = pneg %p523_p11  ;;  %p529_p13 = scmp.lt.s32.totalorder %s527_s16, %s521_s12 }
  0x42   : > { %v179_v23 = vld [vmem:[%s739_s4 + $0x58] sm:$0xff]  ;;  %v196_v24 = vld [vmem:[%s739_s4 + $0xe0] sm:$0xff]  ;;  %v197_v26 = vld [vmem:[%s739_s4 + $0xe8] sm:$0xff] }
  0x43   : > { %234 = vxpose.xlu1.b32.cont [3/16] %v186_v4, 128  ;;  %v180_v25 = vld [vmem:[%s739_s4 + $0x60] sm:$0xff]  ;;  %v181_v27 = vld [vmem:[%s739_s4 + $0x68] sm:$0xff]  ;;  %v198_v28 = vld [vmem:[%s739_s4 + $0xf0] sm:$0xff]  ;;  %p530_p2 = por %p529_p13, %p528_p6 }
  0x44   : > { %202 = vxpose.xlu0.b32.cont [3/16] %v170_v5, 128  ;;  %v182_v29 = vld [vmem:[%s739_s4 + $0x70] sm:$0xff]  ;;  %v199_v30 = vld [vmem:[%s739_s4 + $0xf8] sm:$0xff] }
  0x45   : > { %v183_v31 = vld [vmem:[%s739_s4 + $0x78] sm:$0xff]  ;;  %p531_p5 = pnand %p530_p2, %p524_p0 }
  0x47   : > { %235 = vxpose.xlu1.b32.cont [4/16] %v187_v6, 128 }
  0x48   : > { %203 = vxpose.xlu0.b32.cont [4/16] %v171_v7, 128 }
  0x4b   : > { %236 = vxpose.xlu1.b32.cont [5/16] %v188_v8, 128 }
  0x4c   : > { %204 = vxpose.xlu0.b32.cont [5/16] %v172_v9, 128 }
  0x4f   : > { %237 = vxpose.xlu1.b32.cont [6/16] %v189_v10, 128 }
  0x50   : > { %205 = vxpose.xlu0.b32.cont [6/16] %v173_v11, 128 }
  0x53   : > { %238 = vxpose.xlu1.b32.cont [7/16] %v190_v12, 128 }
  0x54   : > { %206 = vxpose.xlu0.b32.cont [7/16] %v174_v13, 128 }
  0x57   : > { %239 = vxpose.xlu1.b32.cont [8/16] %v191_v14, 128 }
  0x58   : > { %207 = vxpose.xlu0.b32.cont [8/16] %v175_v15, 128 }
  0x5b   : > { %240 = vxpose.xlu1.b32.cont [9/16] %v192_v16, 128 }
  0x5c   : > { %208 = vxpose.xlu0.b32.cont [9/16] %v176_v17, 128 }
  0x5f   : > { %241 = vxpose.xlu1.b32.cont [10/16] %v193_v18, 128 }
  0x60   : > { %209 = vxpose.xlu0.b32.cont [10/16] %v177_v19, 128 }
  0x63   : > { %242 = vxpose.xlu1.b32.cont [11/16] %v194_v20, 128 }
  0x64   : > { %210 = vxpose.xlu0.b32.cont [11/16] %v178_v21, 128 }
  0x67   : > { %243 = vxpose.xlu1.b32.cont [12/16] %v195_v22, 128 }
  0x68   : > { %211 = vxpose.xlu0.b32.cont [12/16] %v179_v23, 128 }
  0x6b   : > { %244 = vxpose.xlu1.b32.cont [13/16] %v196_v24, 128 }
  0x6c   : > { %212 = vxpose.xlu0.b32.cont [13/16] %v180_v25, 128 }
  0x6f   : > { %245 = vxpose.xlu1.b32.cont [14/16] %v197_v26, 128 }
  0x70   : > { %213 = vxpose.xlu0.b32.cont [14/16] %v181_v27, 128 }
  0x73   : > { %246 = vxpose.xlu1.b32.cont [15/16] %v198_v28, 128 }
  0x74   : > { %214 = vxpose.xlu0.b32.cont [15/16] %v182_v29, 128 }
  0x77   : > { %247 = vxpose.xlu1.b32.end [16/16] %v199_v30, 128 }
  0x78   : > { %215 = vxpose.xlu0.b32.end [16/16] %v183_v31, 128 }
  0xbb   : > { %v248_v32 = vpop.trf.xlu1 }
  0xbc   : > { %v216_v33 = vpop.trf.xlu0  ;;  %265 = vst [vmem:[%s779_s18 + $0x8] sm:$0xff] %v248_v32 }
  0xbd   : > { %264 = vst [vmem:[%s779_s18] sm:$0xff] %v216_v33 }
  0xbf   : > { %v249_v34 = vpop.trf.xlu1 }
  0xc0   : > { %v217_v35 = vpop.trf.xlu0  ;;  %267 = vst [vmem:[%s779_s18 + $0x18] sm:$0xff] %v249_v34 }
  0xc1   : > { %266 = vst [vmem:[%s779_s18 + $0x10] sm:$0xff] %v217_v35 }
  0xc3   : > { %v250_v36 = vpop.trf.xlu1 }
  0xc4   : > { %v218_v37 = vpop.trf.xlu0  ;;  %269 = vst [vmem:[%s779_s18 + $0x28] sm:$0xff] %v250_v36 }
  0xc5   : > { %268 = vst [vmem:[%s779_s18 + $0x20] sm:$0xff] %v218_v37 }
  0xc7   : > { %v251_v38 = vpop.trf.xlu1 }
  0xc8   : > { %v219_v39 = vpop.trf.xlu0  ;;  %271 = vst [vmem:[%s779_s18 + $0x38] sm:$0xff] %v251_v38 }
  0xc9   : > { %270 = vst [vmem:[%s779_s18 + $0x30] sm:$0xff] %v219_v39 }
  0xcb   : > { %v252_v40 = vpop.trf.xlu1 }
  0xcc   : > { %v220_v41 = vpop.trf.xlu0  ;;  %273 = vst [vmem:[%s779_s18 + $0x48] sm:$0xff] %v252_v40 }
  0xcd   : > { %272 = vst [vmem:[%s779_s18 + $0x40] sm:$0xff] %v220_v41 }
  0xcf   : > { %v253_v42 = vpop.trf.xlu1 }
  0xd0   : > { %v221_v43 = vpop.trf.xlu0  ;;  %275 = vst [vmem:[%s779_s18 + $0x58] sm:$0xff] %v253_v42 }
  0xd1   : > { %274 = vst [vmem:[%s779_s18 + $0x50] sm:$0xff] %v221_v43 }
  0xd3   : > { %v254_v44 = vpop.trf.xlu1 }
  0xd4   : > { %v222_v45 = vpop.trf.xlu0  ;;  %277 = vst [vmem:[%s779_s18 + $0x68] sm:$0xff] %v254_v44 }
  0xd5   : > { %276 = vst [vmem:[%s779_s18 + $0x60] sm:$0xff] %v222_v45 }
  0xd7   : > { %v255_v46 = vpop.trf.xlu1 }
  0xd8   : > { %v223_v47 = vpop.trf.xlu0  ;;  %279 = vst [vmem:[%s779_s18 + $0x78] sm:$0xff] %v255_v46 }
  0xd9   : > { %278 = vst [vmem:[%s779_s18 + $0x70] sm:$0xff] %v223_v47 }
  0xdb   : > { %v256_v48 = vpop.trf.xlu1 }
  0xdc   : > { %v224_v49 = vpop.trf.xlu0  ;;  %281 = vst [vmem:[%s779_s18 + $0x88] sm:$0xff] %v256_v48 }
  0xdd   : > { %280 = vst [vmem:[%s779_s18 + $0x80] sm:$0xff] %v224_v49 }
  0xdf   : > { %v257_v50 = vpop.trf.xlu1 }
  0xe0   : > { %v225_v51 = vpop.trf.xlu0  ;;  %283 = vst [vmem:[%s779_s18 + $0x98] sm:$0xff] %v257_v50 }
  0xe1   : > { %282 = vst [vmem:[%s779_s18 + $0x90] sm:$0xff] %v225_v51 }
  0xe3   : > { %v258_v52 = vpop.trf.xlu1 }
  0xe4   : > { %v226_v53 = vpop.trf.xlu0  ;;  %285 = vst [vmem:[%s779_s18 + $0xa8] sm:$0xff] %v258_v52 }
  0xe5   : > { %284 = vst [vmem:[%s779_s18 + $0xa0] sm:$0xff] %v226_v53 }
  0xe7   : > { %v259_v54 = vpop.trf.xlu1 }
  0xe8   : > { %v227_v55 = vpop.trf.xlu0  ;;  %287 = vst [vmem:[%s779_s18 + $0xb8] sm:$0xff] %v259_v54 }
  0xe9   : > { %286 = vst [vmem:[%s779_s18 + $0xb0] sm:$0xff] %v227_v55 }
  0xeb   : > { %v260_v56 = vpop.trf.xlu1 }
  0xec   : > { %v228_v57 = vpop.trf.xlu0  ;;  %289 = vst [vmem:[%s779_s18 + $0xc8] sm:$0xff] %v260_v56 }
  0xed   : > { %288 = vst [vmem:[%s779_s18 + $0xc0] sm:$0xff] %v228_v57 }
  0xef   : > { %v261_v58 = vpop.trf.xlu1 }
  0xf0   : > { %v229_v59 = vpop.trf.xlu0  ;;  %291 = vst [vmem:[%s779_s18 + $0xd8] sm:$0xff] %v261_v58 }
  0xf1   : > { %290 = vst [vmem:[%s779_s18 + $0xd0] sm:$0xff] %v229_v59 }
  0xf3   : > { %v262_v60 = vpop.trf.xlu1 }
  0xf4   : > { %v230_v61 = vpop.trf.xlu0  ;;  %293 = vst [vmem:[%s779_s18 + $0xe8] sm:$0xff] %v262_v60 }
  0xf5   : > { %292 = vst [vmem:[%s779_s18 + $0xe0] sm:$0xff] %v230_v61 }
  0xf7   : > { %v263_v62 = vpop.trf.xlu1 }
  0xf8   : > { %v231_v63 = vpop.trf.xlu0  ;;  %295 = vst [vmem:[%s779_s18 + $0xf8] sm:$0xff] %v263_v62 }
  0xf9   : > { %294 = vst [vmem:[%s779_s18 + $0xf0] sm:$0xff] %v231_v63 }
  0xfa   : > { %534 = shalt.err (!%p531_p5)
}
  0xfb   : > { %s535_s17 = scalar_lea.hbm %s816_s5, 4096  ;;  %s539_s24 = scalar_lea.hbm %s870_s1, 8192 }
  0xfc   : > { %p536_p4 = scmp.ne.s32.totalorder %s816_s5, %s535_s17  ;;  %p540_p12 = scmp.lt.u32.totalorder %s816_s5, %s870_s1 }
  0xfd   : > { %p541_p1 = scmp.lt.u32.totalorder %s539_s24, %s535_s17  ;;  %p543_p8 = scmp.lt.u32.totalorder %s535_s17, %s816_s5 }
  0xfe   : > { %p537_p7 = pnand %p536_p4, %p878_p9 }
  0xff   : > { %p542_p3 = por %p541_p1, %p540_p12 }
 0x100   : > { %p538_p10 = pneg %p537_p7 }
 0x101   : > { %p544_p11 = por %p543_p8, %p542_p3 }
 0x103   : > { %p545_p0 = pnand %p544_p11, %p538_p10 }
 0x105   : > { %548 = shalt.err (!%p545_p0)
}
 0x106   : > { %s609_s3 = smov 256   ;;  %s610_s4 = smov 16  }
 0x107   : > { %427 = dma.vmem_to_hbm [thread:$0]  (%p878_p9), %s818_s29, 4096, %s816_s5, %s297_s9, %s609_s3, %s609_s3, %s610_s4  }
 0x108 PF: > { %s330_s18 = sand.u32 1, %s583_s6   ;;  %p879_p6 = scmp.ne.s32.totalorder %s875_s21, 0 }
 0x109   : > { %p880_p13 = scmp.ge.s32.totalorder %s603_s11, 2  ;;  %s331_s27 = scalar_lea.sflag [#allocation4], %s330_s18 }
 0x10b   : > { %p434_p2 = pnand %p880_p13, %p879_p6 }
 0x10d   : > { %578 = dma.done.wait (!%p434_p2), %s331_s27, 4096  }
 0x10e   : > { %580 = vsyncadd (!%p434_p2), %s331_s27, 4294963200  ;;  %s17_s11 = sadd.s32 1, %s603_s11   ;;  %s881_s6 = smov %s587_s7 }
 0x10f   : > { %p14_p5 = scmp.ge.s32.totalorder %s17_s11, 4   ;;  %s882_s7 = smov %s591_s8 }
 0x110   : > { %s883_s8 = smov %s677_s20  ;;  %s884_s9 = smov %s599_s10 }
 0x111   : > { %s885_s10 = smov %s887_s14  ;;  %16 = sbr.rel (!%p14_p5) target bundleno = 6 (0x6), region = 69 }
 0x118   :  { %336 = vsyncpa [#allocation3], 1 }
 0x119   :  { %338 = vsyncpa [#allocation3 + $0x1], 1 }
 0x11a   :  { %339 = vsyncpa [#allocation4], 1 }
 0x11b   :  { %341 = vsyncpa [#allocation4 + $0x1], 1 }

</bundles_post_ra>
